<compile_context>
chip_gen: v5e
topology: v5e:2x2
jax: 0.10.0
libtpu: 0.0.40
codegen_flags: <defaults>
</compile_context>

<pallas_src>
import functools

import jax
import jax.numpy as jnp
from jax.experimental import pallas as pl
from jax.experimental.pallas import tpu as pltpu


def _round_up(x: int, m: int) -> int:
    return ((x + m - 1) // m) * m


# --------------------------------------------------------------------------
# Kernel
# --------------------------------------------------------------------------
def _critic_kernel(x_ref, w_ref, b_ref, o_ref, *, n_layers, in_rows, out_rows):
    # x_ref: (in_rows, bn)   bf16  -- r batch sub-blocks stacked on sublanes
    # w_ref: (L, HR, HR)     bf16  -- block-diagonal (r replicas) per layer
    # b_ref: (L, HR, 1)      f32   -- replicated biases
    # o_ref: (out_rows, bn)  f32   -- lane-dense output slab
    h = x_ref[...]

    # Layer 0: only the first `in_rows` columns of the slab are populated.
    w0 = w_ref[0][:, :in_rows]
    z = jnp.dot(w0, h, preferred_element_type=jnp.float32) + b_ref[0]
    h = jnp.maximum(z, 0.0).astype(jnp.bfloat16)

    # Hidden layers 1 .. L-2 (full (HR, HR) block-diagonal).
    for i in range(1, n_layers - 1):
        z = jnp.dot(w_ref[i], h, preferred_element_type=jnp.float32) + b_ref[i]
        h = jnp.maximum(z, 0.0).astype(jnp.bfloat16)

    # Output layer: only the first `out_rows` rows of the slab are populated.
    last = n_layers - 1
    wl = w_ref[last][:out_rows, :]
    bl = b_ref[last][:out_rows, :]
    y = jnp.dot(wl, h, preferred_element_type=jnp.float32) + bl
    o_ref[...] = jnp.tanh(-(y * y))              # x = tanh(-x**2)


# --------------------------------------------------------------------------
# Tiling plan & parameter packing
# --------------------------------------------------------------------------
def plan_tiles(batch: int, hidden_pad: int, mxu_depth: int = 256):
    """Pick (r, bn): r batch sub-blocks on sublanes (block-diag weight width
    r*hidden_pad ~ MXU depth) and bn lanes per grid step."""
    r_cap = max(1, mxu_depth // hidden_pad)
    r = min(r_cap, max(1, pl.cdiv(batch, 256)))      # don't replicate past the batch
    bn = 128
    # Grow lanes/step to amortize the ~0.35us per-grid-step cost, but keep at
    # least 2 grid blocks once the batch allows it (v7x megacore sharding).
    while bn < 1024 and batch >= 4 * r * bn:
        bn *= 2
    return r, bn


def pack_params(params, *, in_size, out_size, hidden_size, r):
    """Stack torch-layout Linear params into block-diagonal bf16/f32 slabs.

    params: list of (W (out_features, in_features), b (out_features,)).
    Returns (w_stack (L, HR, HR) bf16, b_stack (L, HR, 1) f32).
    """
    h_pad = _round_up(hidden_size, 8)
    in_pad = _round_up(in_size, 8)
    out_pad = _round_up(max(out_size, 1), 8)
    assert in_pad <= h_pad and out_pad <= h_pad, (
        "in/out feature sizes must fit inside the hidden slab")
    hr = r * h_pad
    n_layers = len(params)

    w_slabs, b_slabs = [], []
    for li, (w, b) in enumerate(params):
        fan_out, fan_in = w.shape
        rows = h_pad if li < n_layers - 1 else out_pad
        cols = in_pad if li == 0 else h_pad
        assert fan_out <= rows and fan_in <= cols, (
            f"layer {li}: ({fan_out},{fan_in}) does not fit padded ({rows},{cols})")
        wp = jnp.zeros((rows, cols), jnp.float32).at[:fan_out, :fan_in].set(w)
        bp = jnp.zeros((rows,), jnp.float32).at[:fan_out].set(b)
        wd = jnp.kron(jnp.eye(r, dtype=jnp.float32), wp)           # (r*rows, r*cols)
        bd = jnp.tile(bp, r)                                       # (r*rows,)
        slab = jnp.zeros((hr, hr), jnp.float32).at[:r * rows, :r * cols].set(wd)
        bias = jnp.zeros((hr,), jnp.float32).at[:r * rows].set(bd)
        w_slabs.append(slab)
        b_slabs.append(bias)

    w_stack = jnp.stack(w_slabs).astype(jnp.bfloat16)              # (L, HR, HR)
    b_stack = jnp.stack(b_slabs).astype(jnp.float32)[..., None]    # (L, HR, 1)
    return w_stack, b_stack


# --------------------------------------------------------------------------
# Forward wrapper
# --------------------------------------------------------------------------
def critic_forward(x, w_stack, b_stack, *, in_size, out_size, r, bn):
    """x: (B, in_size) f32 -> (B, out_size) f32."""
    B = x.shape[0]
    n_layers, hr, _ = w_stack.shape
    h_pad = hr // r
    in_pad = _round_up(in_size, 8)
    out_pad = _round_up(max(out_size, 1), 8)
    in_rows = r * in_pad
    out_rows = r * out_pad

    block_b = r * bn
    b_pad = _round_up(max(B, block_b), block_b)
    n_blocks = b_pad // block_b
    cols = b_pad // r                              # total lane columns

    # Batch-on-lanes with r sub-blocks on sublanes: sample s = k*cols + c maps
    # to sub-block k, lane column c. Fuses (under jit) into one pad+transpose.
    xp = jnp.zeros((b_pad, in_pad), jnp.bfloat16)
    xp = xp.at[:B, :in_size].set(x.astype(jnp.bfloat16))
    x_t = xp.reshape(r, cols, in_pad).transpose(0, 2, 1).reshape(in_rows, cols)

    kernel = functools.partial(_critic_kernel, n_layers=n_layers,
                               in_rows=in_rows, out_rows=out_rows)

    flops = 2 * b_pad * (h_pad * in_pad
                         + (n_layers - 2) * h_pad * h_pad
                         + out_pad * h_pad)
    bytes_accessed = (x_t.size * 2 + w_stack.size * 2 + b_stack.size * 4
                      + out_rows * cols * 4)
    cost = pl.CostEstimate(flops=flops,
                           transcendentals=out_pad * b_pad,
                           bytes_accessed=bytes_accessed)

    out = pl.pallas_call(
        kernel,
        grid=(n_blocks,),
        in_specs=[
            pl.BlockSpec((in_rows, bn), lambda i: (0, i)),            # activations
            pl.BlockSpec((n_layers, hr, hr), lambda i: (0, 0, 0)),    # weights (resident)
            pl.BlockSpec((n_layers, hr, 1), lambda i: (0, 0, 0)),     # biases  (resident)
        ],
        out_specs=pl.BlockSpec((out_rows, bn), lambda i: (0, i)),
        out_shape=jax.ShapeDtypeStruct((out_rows, cols), jnp.float32),
        compiler_params=pltpu.CompilerParams(
            dimension_semantics=("parallel",)),
        cost_estimate=cost,
    )(x_t, w_stack, b_stack)

    # Un-interleave the r sub-blocks back into (B, out_size).
    y = out.reshape(r, out_pad, cols).transpose(0, 2, 1).reshape(b_pad, out_pad)
    return y[:B, :out_size]


# --------------------------------------------------------------------------
# Params init (torch.nn.Linear default) and pure-JAX reference
# --------------------------------------------------------------------------
def init_params(key, critic_in_size, critic_layer_size, critic_out_size=1):
    """Torch layout: W is (out_features, in_features), b is (out_features,)."""
    sizes = ([(critic_layer_size, critic_in_size)]
             + [(critic_layer_size, critic_layer_size)] * 3
             + [(critic_out_size, critic_layer_size)])
    params = []
    for fan_out, fan_in in sizes:
        key, kw, kb = jax.random.split(key, 3)
        bound = 1.0 / jnp.sqrt(jnp.float32(fan_in))
        w = jax.random.uniform(kw, (fan_out, fan_in), jnp.float32, -bound, bound)
        b = jax.random.uniform(kb, (fan_out,), jnp.float32, -bound, bound)
        params.append((w, b))
    return params


def _reference_forward(x, params):
    h = x
    for w, b in params[:-1]:
        h = jnp.maximum(h @ w.T + b, 0.0)
    w, b = params[-1]
    y = h @ w.T + b
    return jnp.tanh(-(y * y))


def _run_case(key, batch, in_size, hidden, out_size):
    kx, kp = jax.random.split(key)
    x = jax.random.normal(kx, (batch, in_size), jnp.float32)
    params = init_params(kp, in_size, hidden, out_size)

    h_pad = _round_up(hidden, 8)
    r, bn = plan_tiles(batch, h_pad)
    w_stack, b_stack = pack_params(params, in_size=in_size, out_size=out_size,
                                   hidden_size=hidden, r=r)

    fwd = jax.jit(functools.partial(critic_forward, in_size=in_size,
                                    out_size=out_size, r=r, bn=bn))
    out = jax.block_until_ready(fwd(x, w_stack, b_stack))

    ref = _reference_forward(x, params)
    assert out.shape == (batch, out_size)
    err = float(jnp.max(jnp.abs(out - ref)))
    assert err < 2e-2, f"batch={batch} r={r} bn={bn} err={err}"


if __name__ == "__main__":
    key = jax.random.PRNGKey(0)
    k1, k2 = jax.random.split(key)

    critic_in_size = 6        # forward docstring: (batch_size, 6) state tensor
    critic_layer_size = 32
    critic_out_size = 1

    # Small batch (r=1, single 128-lane block) — matches the module's tiny use.
    _run_case(k1, 8, critic_in_size, critic_layer_size, critic_out_size)
    # Larger batch exercising block-diagonal replication (r>1) and >=2 grid blocks.
    _run_case(k2, 384, critic_in_size, critic_layer_size, critic_out_size)

    print("KERNEL_OK")
</pallas_src>

<mosaic_0001>
module attributes {stable_mosaic.version = 11 : i64} {
  func.func @_critic_kernel(%arg0: i32, %arg1: memref<8x128xbf16, #tpu.memory_space<vmem>>, %arg2: memref<5x32x32xbf16, #tpu.memory_space<vmem>>, %arg3: memref<5x32x1xf32, #tpu.memory_space<vmem>>, %arg4: memref<8x128xf32, #tpu.memory_space<vmem>>) attributes {dimension_semantics = [#tpu.dimension_semantics<parallel>], iteration_bounds = array<i64: 1>, scalar_prefetch = 0 : i64, scratch_operands = 0 : i64, tpu.core_type = #tpu.core_type<tc>, window_params = [{transform_indices = @transform_0, window_bounds = array<i64: 8, 128>}, {pipeline_mode = #tpu.pipeline_mode<synchronous>, transform_indices = @transform_1, window_bounds = array<i64: 5, 32, 32>}, {pipeline_mode = #tpu.pipeline_mode<synchronous>, transform_indices = @transform_2, window_bounds = array<i64: 5, 32, 1>}, {transform_indices = @transform_3, window_bounds = array<i64: 8, 128>}]} {
    %c0 = arith.constant 0 : index
    %c0_0 = arith.constant 0 : index
    %0 = vector.load %arg1[%c0, %c0_0] : memref<8x128xbf16, #tpu.memory_space<vmem>>, vector<8x128xbf16>
    %c0_1 = arith.constant 0 : index
    %c0_2 = arith.constant 0 : index
    %c0_3 = arith.constant 0 : index
    %1 = vector.load %arg2[%c0_1, %c0_2, %c0_3] : memref<5x32x32xbf16, #tpu.memory_space<vmem>>, vector<1x32x32xbf16>
    %2 = vector.shape_cast %1 : vector<1x32x32xbf16> to vector<32x32xbf16>
    %3 = vector.extract_strided_slice %2 {offsets = [0, 0], sizes = [32, 8], strides = [1, 1]} : vector<32x32xbf16> to vector<32x8xbf16>
    %cst = arith.constant dense<0.000000e+00> : vector<32x128xf32>
    %4 = tpu.matmul %3, %0, %cst {dimension_numbers = #tpu.dot_dimension_numbers<[1], [0], [0], [1], [0, 0, 1, 1], [], []>} : vector<32x8xbf16>, vector<8x128xbf16>, vector<32x128xf32> -> vector<32x128xf32>
    %c0_4 = arith.constant 0 : index
    %c0_5 = arith.constant 0 : index
    %c0_6 = arith.constant 0 : index
    %5 = vector.load %arg3[%c0_4, %c0_5, %c0_6] : memref<5x32x1xf32, #tpu.memory_space<vmem>>, vector<1x32x1xf32>
    %6 = vector.shape_cast %5 : vector<1x32x1xf32> to vector<32x1xf32>
    %7 = vector.broadcast %6 : vector<32x1xf32> to vector<32x128xf32>
    %8 = arith.addf %4, %7 : vector<32x128xf32>
    %cst_7 = arith.constant 0.000000e+00 : f32
    %9 = vector.broadcast %cst_7 : f32 to vector<32x128xf32>
    %10 = arith.maximumf %8, %9 : vector<32x128xf32>
    %11 = arith.truncf %10 : vector<32x128xf32> to vector<32x128xbf16>
    %c1 = arith.constant 1 : index
    %c0_8 = arith.constant 0 : index
    %c0_9 = arith.constant 0 : index
    %12 = vector.load %arg2[%c1, %c0_8, %c0_9] : memref<5x32x32xbf16, #tpu.memory_space<vmem>>, vector<1x32x32xbf16>
    %13 = vector.shape_cast %12 : vector<1x32x32xbf16> to vector<32x32xbf16>
    %cst_10 = arith.constant dense<0.000000e+00> : vector<32x128xf32>
    %14 = tpu.matmul %13, %11, %cst_10 {dimension_numbers = #tpu.dot_dimension_numbers<[1], [0], [0], [1], [0, 0, 1, 1], [], []>} : vector<32x32xbf16>, vector<32x128xbf16>, vector<32x128xf32> -> vector<32x128xf32>
    %c1_11 = arith.constant 1 : index
    %c0_12 = arith.constant 0 : index
    %c0_13 = arith.constant 0 : index
    %15 = vector.load %arg3[%c1_11, %c0_12, %c0_13] : memref<5x32x1xf32, #tpu.memory_space<vmem>>, vector<1x32x1xf32>
    %16 = vector.shape_cast %15 : vector<1x32x1xf32> to vector<32x1xf32>
    %17 = vector.broadcast %16 : vector<32x1xf32> to vector<32x128xf32>
    %18 = arith.addf %14, %17 : vector<32x128xf32>
    %cst_14 = arith.constant 0.000000e+00 : f32
    %19 = vector.broadcast %cst_14 : f32 to vector<32x128xf32>
    %20 = arith.maximumf %18, %19 : vector<32x128xf32>
    %21 = arith.truncf %20 : vector<32x128xf32> to vector<32x128xbf16>
    %c2 = arith.constant 2 : index
    %c0_15 = arith.constant 0 : index
    %c0_16 = arith.constant 0 : index
    %22 = vector.load %arg2[%c2, %c0_15, %c0_16] : memref<5x32x32xbf16, #tpu.memory_space<vmem>>, vector<1x32x32xbf16>
    %23 = vector.shape_cast %22 : vector<1x32x32xbf16> to vector<32x32xbf16>
    %cst_17 = arith.constant dense<0.000000e+00> : vector<32x128xf32>
    %24 = tpu.matmul %23, %21, %cst_17 {dimension_numbers = #tpu.dot_dimension_numbers<[1], [0], [0], [1], [0, 0, 1, 1], [], []>} : vector<32x32xbf16>, vector<32x128xbf16>, vector<32x128xf32> -> vector<32x128xf32>
    %c2_18 = arith.constant 2 : index
    %c0_19 = arith.constant 0 : index
    %c0_20 = arith.constant 0 : index
    %25 = vector.load %arg3[%c2_18, %c0_19, %c0_20] : memref<5x32x1xf32, #tpu.memory_space<vmem>>, vector<1x32x1xf32>
    %26 = vector.shape_cast %25 : vector<1x32x1xf32> to vector<32x1xf32>
    %27 = vector.broadcast %26 : vector<32x1xf32> to vector<32x128xf32>
    %28 = arith.addf %24, %27 : vector<32x128xf32>
    %cst_21 = arith.constant 0.000000e+00 : f32
    %29 = vector.broadcast %cst_21 : f32 to vector<32x128xf32>
    %30 = arith.maximumf %28, %29 : vector<32x128xf32>
    %31 = arith.truncf %30 : vector<32x128xf32> to vector<32x128xbf16>
    %c3 = arith.constant 3 : index
    %c0_22 = arith.constant 0 : index
    %c0_23 = arith.constant 0 : index
    %32 = vector.load %arg2[%c3, %c0_22, %c0_23] : memref<5x32x32xbf16, #tpu.memory_space<vmem>>, vector<1x32x32xbf16>
    %33 = vector.shape_cast %32 : vector<1x32x32xbf16> to vector<32x32xbf16>
    %cst_24 = arith.constant dense<0.000000e+00> : vector<32x128xf32>
    %34 = tpu.matmul %33, %31, %cst_24 {dimension_numbers = #tpu.dot_dimension_numbers<[1], [0], [0], [1], [0, 0, 1, 1], [], []>} : vector<32x32xbf16>, vector<32x128xbf16>, vector<32x128xf32> -> vector<32x128xf32>
    %c3_25 = arith.constant 3 : index
    %c0_26 = arith.constant 0 : index
    %c0_27 = arith.constant 0 : index
    %35 = vector.load %arg3[%c3_25, %c0_26, %c0_27] : memref<5x32x1xf32, #tpu.memory_space<vmem>>, vector<1x32x1xf32>
    %36 = vector.shape_cast %35 : vector<1x32x1xf32> to vector<32x1xf32>
    %37 = vector.broadcast %36 : vector<32x1xf32> to vector<32x128xf32>
    %38 = arith.addf %34, %37 : vector<32x128xf32>
    %cst_28 = arith.constant 0.000000e+00 : f32
    %39 = vector.broadcast %cst_28 : f32 to vector<32x128xf32>
    %40 = arith.maximumf %38, %39 : vector<32x128xf32>
    %41 = arith.truncf %40 : vector<32x128xf32> to vector<32x128xbf16>
    %c4 = arith.constant 4 : index
    %c0_29 = arith.constant 0 : index
    %c0_30 = arith.constant 0 : index
    %42 = vector.load %arg2[%c4, %c0_29, %c0_30] : memref<5x32x32xbf16, #tpu.memory_space<vmem>>, vector<1x32x32xbf16>
    %43 = vector.shape_cast %42 : vector<1x32x32xbf16> to vector<32x32xbf16>
    %44 = vector.extract_strided_slice %43 {offsets = [0, 0], sizes = [8, 32], strides = [1, 1]} : vector<32x32xbf16> to vector<8x32xbf16>
    %c4_31 = arith.constant 4 : index
    %c0_32 = arith.constant 0 : index
    %c0_33 = arith.constant 0 : index
    %45 = vector.load %arg3[%c4_31, %c0_32, %c0_33] : memref<5x32x1xf32, #tpu.memory_space<vmem>>, vector<1x32x1xf32>
    %46 = vector.shape_cast %45 : vector<1x32x1xf32> to vector<32x1xf32>
    %47 = vector.extract_strided_slice %46 {offsets = [0, 0], sizes = [8, 1], strides = [1, 1]} : vector<32x1xf32> to vector<8x1xf32>
    %cst_34 = arith.constant dense<0.000000e+00> : vector<8x128xf32>
    %48 = tpu.matmul %44, %41, %cst_34 {dimension_numbers = #tpu.dot_dimension_numbers<[1], [0], [0], [1], [0, 0, 1, 1], [], []>} : vector<8x32xbf16>, vector<32x128xbf16>, vector<8x128xf32> -> vector<8x128xf32>
    %49 = vector.broadcast %47 : vector<8x1xf32> to vector<8x128xf32>
    %50 = arith.addf %48, %49 : vector<8x128xf32>
    %51 = arith.mulf %50, %50 : vector<8x128xf32>
    %cst_35 = arith.constant 0.000000e+00 : f32
    %52 = vector.broadcast %cst_35 : f32 to vector<8x128xf32>
    %53 = arith.subf %52, %51 : vector<8x128xf32>
    %54 = math.tanh %53 : vector<8x128xf32>
    %c0_36 = arith.constant 0 : index
    %c0_37 = arith.constant 0 : index
    %55 = vector.load %arg4[%c0_36, %c0_37] : memref<8x128xf32, #tpu.memory_space<vmem>>, vector<8x128xf32>
    tpu.vector_store %arg4[%c0_36, %c0_37], %54 {strides = array<i32>} : memref<8x128xf32, #tpu.memory_space<vmem>>, vector<8x128xf32>,
    return
  }
  func.func @transform_0(%arg0: i32) -> (i32, i32) {
    %c0_i32 = arith.constant 0 : i32
    %c0_i32_0 = arith.constant 0 : i32
    return %c0_i32, %arg0 : i32, i32
  }
  func.func @transform_1(%arg0: i32) -> (i32, i32, i32) {
    %c0_i32 = arith.constant 0 : i32
    %c0_i32_0 = arith.constant 0 : i32
    %c0_i32_1 = arith.constant 0 : i32
    %c0_i32_2 = arith.constant 0 : i32
    return %c0_i32, %c0_i32_0, %c0_i32_1 : i32, i32, i32
  }
  func.func @transform_2(%arg0: i32) -> (i32, i32, i32) {
    %c0_i32 = arith.constant 0 : i32
    %c0_i32_0 = arith.constant 0 : i32
    %c0_i32_1 = arith.constant 0 : i32
    %c0_i32_2 = arith.constant 0 : i32
    return %c0_i32, %c0_i32_0, %c0_i32_1 : i32, i32, i32
  }
  func.func @transform_3(%arg0: i32) -> (i32, i32) {
    %c0_i32 = arith.constant 0 : i32
    %c0_i32_0 = arith.constant 0 : i32
    return %c0_i32, %arg0 : i32, i32
  }
}

</mosaic_0001>

<bundles_post_ra>
// kernel: critic_forward.1
= control target key start
LH: loop header
LB: loop body
LE: loop exit
PB: predicated region body
PF: predicated region fallthrough
CT: control target
= control target key end

     0   :  { %vm61_vm0 = vcmask 1043456   ;;  %v418_v0 = vmov 0   ;;  %vm54_vm1 = vcmask 64512   ;;  %vm130_vm2 = vcmask 261120   ;;  %s530_s2 = inlined_call_operand.vmem [shape: f32[5,32,1], index: 2, kind: input, shape index: {}]   ;;  %s531_s0 = inlined_call_operand.vmem [shape: bf16[8,128], index: 0, kind: input, shape index: {}]   ;;  %s532_s1 = inlined_call_operand.vmem [shape: bf16[5,32,32], index: 1, kind: input, shape index: {}]   ;;  %s533_s3 = inlined_call_operand.vmem [shape: f32[8,128], index: 3, kind: output, shape index: {}]  }
   0x1   :  { %414 = vset.pattern.permute.xlu1 %v418_v0  ;;  %413 = vset.pattern.permute.xlu0 %v418_v0  ;;  %v22_v1 = vld [vmem:[%s530_s2 + $0x10] sm:$0xff]  ;;  %v20_v2 = vld [vmem:[%s530_s2] sm:$0xff]  ;;  %v23_v6 = vld [vmem:[%s530_s2 + $0x18] sm:$0xff] }
   0x2   :  { %v15_v3 = vld [vmem:[%s531_s0] sm:$0xf]  ;;  %36 = vperm.xlu0 %413, %v22_v1   ;;  %26 = vperm.xlu1 %414, %v20_v2   ;;  %v21_v7 = vld [vmem:[%s530_s2 + $0x8] sm:$0xff]  ;;  %v372_v11 = vld [vmem:[%s530_s2 + $0x58] sm:$0xff] }
   0x3   :  { %v63_v4 = vsel %vm61_vm0, %v15_v3, 0  ;;  %v404_v5 = vld [vmem:[%s532_s1] sm:$0xff]  ;;  %415 = vset.pattern.permute.xlu2 %v418_v0  ;;  %v352_v9 = vld [vmem:[%s530_s2 + $0x28] sm:$0xff]  ;;  %v389_v13 = vld [vmem:[%s530_s2 + $0x70] sm:$0xff] }
   0x4   :  { %72 = vmatpush.bf16.msra.mxu0 %v63_v4  ;;  %v351_v8 = vld [vmem:[%s530_s2 + $0x20] sm:$0xff]  ;;  %v405_v10 = vld [vmem:[%s532_s1 + $0x8] sm:$0xff]  ;;  %v390_v14 = vld [vmem:[%s530_s2 + $0x78] sm:$0xff] }
   0x5   :  { %v369_v12 = vld [vmem:[%s530_s2 + $0x40] sm:$0xff]  ;;  %v388_v15 = vld [vmem:[%s530_s2 + $0x68] sm:$0xff]  ;;  %v353_v22 = vld [vmem:[%s530_s2 + $0x30] sm:$0xff] }
   0x6   :  { %v402_v16 = vld [vmem:[%s530_s2 + $0x80] sm:$0xff]  ;;  %112 = vperm.xlu2 %415, %v353_v22   ;;  %v354_v32 = vld [vmem:[%s530_s2 + $0x38] sm:$0xff]  ;;  %v406_v37 = vld [vmem:[%s532_s1 + $0x10] sm:$0xff] }
   0x7   :  { %345 = vmatmul.msk.bf16.vlgmr.msra.gmra.mxu0 %vm54_vm1, %v404_v5  ;;  %v371_v38 = vld [vmem:[%s530_s2 + $0x50] sm:$0xff]  ;;  %v370_v39 = vld [vmem:[%s530_s2 + $0x48] sm:$0xff]  ;;  %v407_v40 = vld [vmem:[%s532_s1 + $0x18] sm:$0xff] }
   0x8   :  { %v387_v41 = vld [vmem:[%s530_s2 + $0x60] sm:$0xff]  ;;  %v409_v61 = vld [vmem:[%s532_s1 + $0x28] sm:$0xff] }
   0x9   :  { %v408_v60 = vld [vmem:[%s532_s1 + $0x20] sm:$0xff] }
   0xa   :  { %41 = vperm.xlu0 %413, %v23_v6   ;;  %31 = vperm.xlu1 %414, %v21_v7  }
   0xe   :  { %117 = vperm.xlu2 %415, %v354_v32  }
  0x12   :  { %102 = vperm.xlu0 %413, %v351_v8   ;;  %107 = vperm.xlu1 %414, %v352_v9  }
  0x16   :  { %184 = vperm.xlu2 %415, %v371_v38  }
  0x17   :  { %346 = vmatmul.msk.bf16.gmra.mxu0 %vm54_vm1, %v405_v10 }
  0x1a   :  { %189 = vperm.xlu0 %413, %v372_v11   ;;  %174 = vperm.xlu1 %414, %v369_v12  }
  0x1e   :  { %179 = vperm.xlu2 %415, %v370_v39  }
  0x22   :  { %255 = vperm.xlu0 %413, %v389_v13   ;;  %260 = vperm.xlu1 %414, %v390_v14  }
  0x26   :  { %245 = vperm.xlu2 %415, %v387_v41  }
  0x2a   :  { %250 = vperm.xlu0 %413, %v388_v15   ;;  %310 = vperm.xlu1 %414, %v402_v16   ;;  %v410_v16 = vld [vmem:[%s532_s1 + $0x30] sm:$0xff] }
  0x60   :  { %v113_v44 = vpop.permute.xlu2 %112 }
  0x68   :  { %v118_v48 = vpop.permute.xlu2 %117 }
  0x70   :  { %v185_v0 = vpop.permute.xlu2 %184 }
  0x74   :  { %v37_v19 = vpop.permute.xlu0 %36  ;;  %v27_v20 = vpop.permute.xlu1 %26 }
  0x78   :  { %v180_v4 = vpop.permute.xlu2 %179 }
  0x7c   :  { %v42_v23 = vpop.permute.xlu0 %41  ;;  %v32_v25 = vpop.permute.xlu1 %31 }
  0x84   :  { %v74_v17 = vpop.f32.mrf.mxu0  ;;  %v108_v46 = vpop.permute.xlu1 %107 }
  0x85   :  { %v75_v29 = vadd.f32 %v74_v17, %v27_v20  ;;  %v103_v52 = vpop.permute.xlu0 %102  ;;  %v411_v17 = vld [vmem:[%s532_s1 + $0x38] sm:$0xff] }
  0x87   :  { %v84_v35 = vmax.f32 %v75_v29, 0.0 }
  0x8c   :  { %v76_v18 = vpop.f32.mrf.mxu0  ;;  %v175_v8 = vpop.permute.xlu1 %174 }
  0x8d   :  { %v77_v27 = vadd.f32 %v76_v18, %v32_v25  ;;  %v190_v2 = vpop.permute.xlu0 %189 }
  0x8f   :  { %v85_v33 = vmax.f32 %v77_v27, 0.0 }
  0x91   :  { %v88_v36 = vpack.c.bf16 %v85_v33, %v84_v35 }
  0x94   :  { %v79_v21 = vpop.f32.mrf.mxu0  ;;  %v261_v22 = vpop.permute.xlu1 %260 }
  0x95   :  { %v80_v24 = vadd.f32 %v79_v21, %v37_v19  ;;  %v256_v20 = vpop.permute.xlu0 %255 }
  0x97   :  { %v86_v30 = vmax.f32 %v80_v24, 0.0 }
  0x9c   :  { %v81_v26 = vpop.f32.mrf.mxu0 }
  0x9d   :  { %v82_v28 = vadd.f32 %v81_v26, %v42_v23  ;;  %v251_v24 = vpop.permute.xlu0 %250 }
  0x9f   :  { %v87_v31 = vmax.f32 %v82_v28, 0.0  ;;  %v246_v28 = vpop.permute.xlu2 %245 }
  0xa1   :  { %v89_v34 = vpack.c.bf16 %v87_v31, %v86_v30 }
  0xa3   :  { %143 = vmatpush.bf16.msra.mxu1 %v89_v34 }
  0xa7   :  { %144 = vmatpush.bf16.msra.mxu1 %v88_v36  ;;  %v401_v36 = vld [vmem:[%s532_s1 + $0x40] sm:$0xf] }
  0xaa   :  { %363 = vmatmul.msk.bf16.vlgmr.msra.gmra.mxu1 %vm130_vm2, %v406_v37  ;;  %v311_v37 = vpop.permute.xlu1 %310 }
  0xba   :  { %364 = vmatmul.msk.bf16.gmra.mxu1 %vm130_vm2, %v407_v40 }
 0x127   :  { %v146_v42 = vpop.f32.mrf.mxu1 }
 0x128   :  { %v147_v53 = vadd.f32 %v146_v42, %v103_v52 }
 0x12a   :  { %v156_v58 = vmax.f32 %v147_v53, 0.0 }
 0x12f   :  { %v148_v43 = vpop.f32.mrf.mxu1 }
 0x130   :  { %v149_v50 = vadd.f32 %v148_v43, %v108_v46 }
 0x132   :  { %v157_v56 = vmax.f32 %v149_v50, 0.0 }
 0x134   :  { %v160_v59 = vpack.c.bf16 %v157_v56, %v156_v58 }
 0x137   :  { %v151_v45 = vpop.f32.mrf.mxu1 }
 0x138   :  { %v152_v47 = vadd.f32 %v151_v45, %v113_v44 }
 0x13a   :  { %v158_v54 = vmax.f32 %v152_v47, 0.0 }
 0x13f   :  { %v153_v49 = vpop.f32.mrf.mxu1 }
 0x140   :  { %v154_v51 = vadd.f32 %v153_v49, %v118_v48 }
 0x142   :  { %v159_v55 = vmax.f32 %v154_v51, 0.0 }
 0x144   :  { %v161_v57 = vpack.c.bf16 %v159_v55, %v158_v54 }
 0x146   :  { %214 = vmatpush.bf16.msra.mxu2 %v161_v57 }
 0x14a   :  { %215 = vmatpush.bf16.msra.mxu2 %v160_v59 }
 0x14d   :  { %381 = vmatmul.msk.bf16.vlgmr.msra.gmra.mxu2 %vm130_vm2, %v408_v60 }
 0x15d   :  { %382 = vmatmul.msk.bf16.gmra.mxu2 %vm130_vm2, %v409_v61 }
 0x1d0   :  { %v217_v62 = vpop.f32.mrf.mxu2 }
 0x1d1   :  { %v218_v9 = vadd.f32 %v217_v62, %v175_v8 }
 0x1d3   :  { %v227_v14 = vmax.f32 %v218_v9, 0.0 }
 0x1d8   :  { %v219_v63 = vpop.f32.mrf.mxu2 }
 0x1d9   :  { %v220_v6 = vadd.f32 %v219_v63, %v180_v4 }
 0x1db   :  { %v228_v12 = vmax.f32 %v220_v6, 0.0 }
 0x1dd   :  { %v231_v15 = vpack.c.bf16 %v228_v12, %v227_v14 }
 0x1e0   :  { %v222_v1 = vpop.f32.mrf.mxu2 }
 0x1e1   :  { %v223_v3 = vadd.f32 %v222_v1, %v185_v0 }
 0x1e3   :  { %v229_v10 = vmax.f32 %v223_v3, 0.0 }
 0x1e8   :  { %v224_v5 = vpop.f32.mrf.mxu2 }
 0x1e9   :  { %v225_v7 = vadd.f32 %v224_v5, %v190_v2 }
 0x1eb   :  { %v230_v11 = vmax.f32 %v225_v7, 0.0 }
 0x1ed   :  { %v232_v13 = vpack.c.bf16 %v230_v11, %v229_v10 }
 0x1ef   :  { %285 = vmatpush.bf16.msra.mxu3 %v232_v13 }
 0x1f3   :  { %286 = vmatpush.bf16.msra.mxu3 %v231_v15 }
 0x1f6   :  { %399 = vmatmul.msk.bf16.vlgmr.msra.gmra.mxu3 %vm130_vm2, %v410_v16 }
 0x206   :  { %400 = vmatmul.msk.bf16.gmra.mxu3 %vm130_vm2, %v411_v17 }
 0x279   :  { %v288_v18 = vpop.f32.mrf.mxu3 }
 0x27a   :  { %v289_v29 = vadd.f32 %v288_v18, %v246_v28 }
 0x27c   :  { %v298_v34 = vmax.f32 %v289_v29, 0.0 }
 0x281   :  { %v290_v19 = vpop.f32.mrf.mxu3 }
 0x282   :  { %v291_v26 = vadd.f32 %v290_v19, %v251_v24 }
 0x284   :  { %v299_v32 = vmax.f32 %v291_v26, 0.0 }
 0x286   :  { %v302_v35 = vpack.c.bf16 %v299_v32, %v298_v34 }
 0x289   :  { %v293_v21 = vpop.f32.mrf.mxu3 }
 0x28a   :  { %v294_v23 = vadd.f32 %v293_v21, %v256_v20 }
 0x28c   :  { %v300_v30 = vmax.f32 %v294_v23, 0.0 }
 0x291   :  { %v295_v25 = vpop.f32.mrf.mxu3 }
 0x292   :  { %v296_v27 = vadd.f32 %v295_v25, %v261_v22 }
 0x294   :  { %v301_v31 = vmax.f32 %v296_v27, 0.0 }
 0x296   :  { %v303_v33 = vpack.c.bf16 %v301_v31, %v300_v30 }
 0x298   :  { %322 = vmatpush.bf16.msrb.mxu0 %v303_v33 }
 0x29c   :  { %323 = vmatpush.bf16.msrb.mxu0 %v302_v35 }
 0x29f   :  { %403 = vmatmul.msk.bf16.vlgmr.msrb.gmra.mxu0 %vm130_vm2, %v401_v36 }
 0x31c   :  { %v325_v38 = vpop.f32.mrf.mxu0 }
 0x31d   :  { %v326_v39 = vadd.f32 %v325_v38, %v311_v37 }
 0x31f   :  { %v329_v40 = vmul.f32 %v326_v39, %v326_v39 }
 0x321   :  { %v330_v41 = vsub.f32 0.0, %v329_v40 }
 0x323   :  { %416 = vtanh.f32 %v330_v41 }
 0x324   :  { %v327_v42 = vpop.f32.mrf.mxu0 }
 0x329   :  { %v417_v43 = vpop.eup %416 }
 0x32a   :  { %332 = vst [vmem:[%s533_s3] sm:$0xff] %v417_v43 }

</bundles_post_ra>
